<compile_context>
chip_gen: v5e
topology: v5e:2x2
jax: 0.10.0
libtpu: 0.0.40
codegen_flags: <defaults>
</compile_context>

<pallas_src>
import functools

import jax
import jax.numpy as jnp
from jax.experimental import pallas as pl
from jax.experimental.pallas import tpu as pltpu


_MAX_TILE_ROWS = 32768                 # sanity ceiling; the byte budget is the real cap
_DEFAULT_VMEM_CAP = 64 * 1024 * 1024   # conservative fallback (v7x per-TC physical VMEM)


def _round_up(a, b):
    return (a + b - 1) // b * b


def _cdiv(a, b):
    return (a + b - 1) // b


def _vmem_capacity_bytes():
    try:
        return int(pltpu.get_tpu_info().vmem_capacity_bytes)
    except Exception:  # unknown backend / API drift -> conservative default
        return _DEFAULT_VMEM_CAP


def _gap_kernel_single(x_ref, o_ref, *, inv_hw):
    # Full-width H*W chunk: reduce the lane axis straight into the output.
    # Widening to f32 is fused into the reduce (no materialized f32 copy for bf16).
    s = jnp.sum(x_ref[...], axis=-1, keepdims=True, dtype=jnp.float32)
    o_ref[...] = (s * inv_hw).astype(o_ref.dtype)


def _gap_kernel_multi(x_ref, o_ref, acc_ref, *, inv_hw, k_chunk, hw):
    # Chunked H*W (huge spatial): accumulate partial lane sums in f32 scratch.
    k = pl.program_id(1)

    @pl.when(k == 0)
    def _():
        acc_ref[...] = jnp.zeros_like(acc_ref)

    x = x_ref[...]
    if hw % k_chunk != 0:
        # Masked tail chunk: zero out-of-range lanes (select, so garbage NaN/Inf safe).
        rem = hw - k * k_chunk
        lane = jax.lax.broadcasted_iota(jnp.int32, x.shape, 1)
        x = jnp.where(lane < rem, x, jnp.zeros_like(x))
    acc_ref[...] += jnp.sum(x, axis=-1, keepdims=True, dtype=jnp.float32)

    @pl.when(k == pl.num_programs(1) - 1)
    def _():
        o_ref[...] = (acc_ref[...] * inv_hw).astype(o_ref.dtype)


def global_avg_pool2d(x, *, _lane_chunk_override=None):
    """Equivalent to F.avg_pool2d(x, kernel_size=x.shape[2:]) for NCHW float input.

    _lane_chunk_override is a test-only hook to force the chunked (masked-tail) path
    on small inputs.
    """
    assert x.ndim == 4, "expected NCHW input"
    N, C, H, W = x.shape
    rows = N * C
    hw = H * W
    itemsize = jnp.dtype(x.dtype).itemsize
    sublane = max(8, 32 // itemsize)  # sublane packing: 8 (f32), 16 (bf16), 32 (int8)

    # Free view for row-major NCHW: each row is one (n, c) spatial plane.
    x2d = x.reshape(rows, hw)

    # ---- generation-aware VMEM budget ---------------------------------------
    cap = _vmem_capacity_bytes()
    # Total budget for all pipelined buffers (2x input, 2x output, accumulator):
    # ~20 MiB fits v7x's 64 MiB physical VMEM with headroom and is plenty on v5e/v6e.
    total_budget = min(20 * 1024 * 1024, cap // 3)
    input_budget = total_budget // 3  # single input buffer share while picking k_chunk

    # ---- lane (H*W) chunking -------------------------------------------------
    if _lane_chunk_override is not None:
        k_chunk = int(_lane_chunk_override)
        num_k = _cdiv(hw, k_chunk)
    elif sublane * _round_up(hw, 128) * itemsize <= input_budget:
        k_chunk, num_k = hw, 1
    else:
        max_lanes = max(128, (input_budget // (sublane * itemsize)) // 128 * 128)
        k_chunk = max_lanes
        # Prefer an exact 128-aligned divisor in the top half (skips the tail mask);
        # otherwise use ceil-div chunks with an in-kernel mask on the last chunk.
        for c in range(max_lanes, max(127, max_lanes // 2), -128):
            if hw % c == 0:
                k_chunk = c
                break
        num_k = _cdiv(hw, k_chunk)

    # ---- row tiling (padding-aware VMEM accounting) --------------------------
    in_row_bytes = 2 * _round_up(k_chunk, 128) * itemsize   # double-buffered input slab
    out_row_bytes = 2 * 128 * itemsize                      # (rows, 1) block pads to 128 lanes
    acc_row_bytes = 128 * 4 if num_k > 1 else 0             # f32 accumulator scratch
    row_bytes = in_row_bytes + out_row_bytes + acc_row_bytes

    max_rows = max(sublane, (total_budget // row_bytes) // sublane * sublane)
    tile_rows = min(max_rows, _MAX_TILE_ROWS, _round_up(rows, sublane))

    # v7x megacore: keep >= 2 steps on the parallel row axis whenever possible so both
    # TensorCores get work (neutral on single-TC v5e/v6e).
    if rows > sublane and _cdiv(rows, tile_rows) < 2:
        tile_rows = _round_up(_cdiv(rows, 2), sublane)

    grid_rows = _cdiv(rows, tile_rows)
    inv_hw = 1.0 / float(hw)

    compiler_params = pltpu.CompilerParams(
        dimension_semantics=("parallel",) if num_k == 1 else ("parallel", "arbitrary"),
        # Explicit scoped-VMEM limit: lets the multi-MiB tiles compile on v5e (16 MiB
        # default) while staying well inside v7x's 64 MiB physical VMEM.
        vmem_limit_bytes=max(16 * 1024 * 1024, min(32 * 1024 * 1024, cap // 2)),
    )
    out_shape = jax.ShapeDtypeStruct((rows, 1), x.dtype)

    if num_k == 1:
        # Common path: whole H*W on the lane axis, no scratch, 1-D grid over row tiles.
        out2d = pl.pallas_call(
            functools.partial(_gap_kernel_single, inv_hw=inv_hw),
            out_shape=out_shape,
            grid_spec=pltpu.PrefetchScalarGridSpec(
                num_scalar_prefetch=0,
                grid=(grid_rows,),
                in_specs=[pl.BlockSpec((tile_rows, hw), lambda i: (i, 0))],
                out_specs=pl.BlockSpec((tile_rows, 1), lambda i: (i, 0)),
            ),
            compiler_params=compiler_params,
        )(x2d)
    else:
        # Huge / ragged H*W: chunk the lane axis (reduction axis last), masked tail.
        out2d = pl.pallas_call(
            functools.partial(_gap_kernel_multi, inv_hw=inv_hw, k_chunk=k_chunk, hw=hw),
            out_shape=out_shape,
            grid_spec=pltpu.PrefetchScalarGridSpec(
                num_scalar_prefetch=0,
                grid=(grid_rows, num_k),
                in_specs=[pl.BlockSpec((tile_rows, k_chunk), lambda i, k: (i, k))],
                out_specs=pl.BlockSpec((tile_rows, 1), lambda i, k: (i, 0)),
                scratch_shapes=[pltpu.VMEM((tile_rows, 1), jnp.float32)],
            ),
            compiler_params=compiler_params,
        )(x2d)

    return out2d.reshape(N, C, 1, 1)


if __name__ == "__main__":
    key = jax.random.PRNGKey(0)

    # Small NCHW input consistent with the module's forward.
    x = jax.random.normal(key, (2, 4, 16, 16), dtype=jnp.float32)
    out = global_avg_pool2d(x)
    out = jax.block_until_ready(out)
    ref = jnp.mean(x, axis=(2, 3), keepdims=True)
    assert out.shape == (2, 4, 1, 1), out.shape
    assert jnp.allclose(out, ref, atol=1e-5, rtol=1e-5), "mismatch vs reference"

    # Exercise the chunked / masked-tail path (ragged H*W) at a small shape by forcing
    # a 128-lane chunk; validates the multi-chunk kernel on real hardware.
    x2 = jax.random.normal(jax.random.PRNGKey(1), (2, 4, 13, 11), dtype=jnp.float32)
    out2 = global_avg_pool2d(x2, _lane_chunk_override=128)
    out2 = jax.block_until_ready(out2)
    ref2 = jnp.mean(x2, axis=(2, 3), keepdims=True)
    assert out2.shape == (2, 4, 1, 1), out2.shape
    assert jnp.allclose(out2, ref2, atol=1e-5, rtol=1e-5), "mismatch vs reference (ragged)"

    print("KERNEL_OK")
</pallas_src>

<mosaic_0001>
module attributes {stable_mosaic.version = 11 : i64} {
  func.func @_gap_kernel_single(%arg0: i32, %arg1: memref<8x256xf32, #tpu.memory_space<vmem>>, %arg2: memref<8x1xf32, #tpu.memory_space<vmem>>) attributes {dimension_semantics = [#tpu.dimension_semantics<parallel>], iteration_bounds = array<i64: 1>, scalar_prefetch = 0 : i64, scratch_operands = 0 : i64, tpu.core_type = #tpu.core_type<tc>, window_params = [{transform_indices = @transform_0, window_bounds = array<i64: 8, 256>}, {transform_indices = @transform_1, window_bounds = array<i64: 8, 1>}]} {
    %c0 = arith.constant 0 : index
    %c0_0 = arith.constant 0 : index
    %0 = vector.load %arg1[%c0, %c0_0] : memref<8x256xf32, #tpu.memory_space<vmem>>, vector<8x256xf32>
    %cst = arith.constant dense<0.000000e+00> : vector<8xf32>
    %1 = vector.multi_reduction <add>, %0, %cst [1] : vector<8x256xf32> to vector<8xf32>
    %2 = vector.shape_cast %1 : vector<8xf32> to vector<8x1xf32>
    %cst_1 = arith.constant 3.906250e-03 : f32
    %3 = vector.broadcast %cst_1 : f32 to vector<8x1xf32>
    %4 = arith.mulf %2, %3 : vector<8x1xf32>
    %c0_2 = arith.constant 0 : index
    %c0_3 = arith.constant 0 : index
    %5 = vector.load %arg2[%c0_2, %c0_3] : memref<8x1xf32, #tpu.memory_space<vmem>>, vector<8x1xf32>
    tpu.vector_store %arg2[%c0_2, %c0_3], %4 {strides = array<i32>} : memref<8x1xf32, #tpu.memory_space<vmem>>, vector<8x1xf32>,
    return
  }
  func.func @transform_0(%arg0: i32) -> (i32, i32) {
    %c0_i32 = arith.constant 0 : i32
    %c0_i32_0 = arith.constant 0 : i32
    return %arg0, %c0_i32 : i32, i32
  }
  func.func @transform_1(%arg0: i32) -> (i32, i32) {
    %c0_i32 = arith.constant 0 : i32
    %c0_i32_0 = arith.constant 0 : i32
    return %arg0, %c0_i32 : i32, i32
  }
}

</mosaic_0001>

<bundles_post_ra>
// kernel: tpu_custom_call.1
= control target key start
LH: loop header
LB: loop body
LE: loop exit
PB: predicated region body
PF: predicated region fallthrough
CT: control target
= control target key end

     0   :  { %6 = vsyncpa [#allocation3], 0  ;;  %s62_s9 = smov [#allocation2]   ;;  %s79_s0 = inlined_call_operand.hbm [shape: f32[8,256], index: 0, kind: input, shape index: {}]   ;;  %s80_s1 = inlined_call_operand.vmem [shape: f32[8,1], index: 1, kind: output, shape index: {}]  }
   0x1   :  { %s12_s8 = sshll.u32 %s79_s0, 4  ;;  %s14_s10 = sshll.u32 %s62_s9, 4  ;;  %s13_s8 = int_to_ptr.hbm [resolvable:$true] %s12_s8  ;;  %s15_s10 = int_to_ptr.vmem [resolvable:$true] %s14_s10 }
   0x2   :  { %17 = dma.hbm_to_vmem [thread:$0]  %s13_s8, 256, %s15_s10, [#allocation3]  }
   0x3   :  { %60 = dma.done.wait [#allocation3], 256  }
   0x4   :  { %61 = vsyncadd [#allocation3], 4294967040  ;;  %v22_v0 = vld [vmem:[#allocation2] sm:$0xff]  ;;  %v23_v1 = vld [vmem:[#allocation2 + $0x8] sm:$0xff]  ;;  %vm28_vm0 = vcmask 7168  }
   0x5   :  { %v24_v2 = vadd.f32 %v23_v1, %v22_v0 }
   0x7   :  { %25 = vadd.xlane.f32.xlu0 %v24_v2 }
  0x7a   :  { %v26_v3 = vpop.xlane.xlu0 %25 }
  0x7b   :  { %v27_v4 = vmul.f32 0.00390625, %v26_v3 }
  0x7d   :  { %29 = vst.msk [vmem:[%s80_s1] sm:$0xff] %vm28_vm0, %v27_v4 }
  0x7e   :  { %34 = vsyncpa [#allocation3], 1 }

</bundles_post_ra>
